<compile_context>
chip_gen: v7x
topology: tpu7x:2x2x1
jax: 0.10.0
libtpu: 0.0.40
codegen_flags: <defaults>
</compile_context>

<pallas_src>
import math

import jax
import jax.numpy as jnp
from jax.experimental import pallas as pl
from jax.experimental.pallas import tpu as pltpu

BN_EPS = 1e-5


def _round_up(x, m):
    return (x + m - 1) // m * m


def _vmem_limit_bytes():
    """Generation-aware scoped-VMEM limit: ~half of physical VMEM (32 MiB on
    v7x's 64 MiB, 64 MiB on v5e/v6e's 128 MiB), with a conservative fallback."""
    cap = 128 * 1024 * 1024
    try:
        info_fn = getattr(pltpu, "get_tpu_info", None)
        if info_fn is not None:
            cap = int(info_fn().vmem_capacity_bytes)
    except Exception:  # pragma: no cover - defensive: keep the fallback cap
        pass
    return max(32 * 1024 * 1024, min(cap // 2, 64 * 1024 * 1024))


def _pick_m_tile(cin, cout, m, target, budget_bytes):
    """Largest lane tile (multiple of 128) whose double-buffered pass working
    set stays inside the VMEM budget.  Padding-aware: sublane counts rounded
    up to 8 so tiny Cin/Cout do not under-estimate real VMEM use."""
    mt = min(_round_up(target, 128), _round_up(m, 128))
    x_rows = _round_up(4 * cin, 8)        # (4*Cin, mt) input slab rows (f32)
    y_rows = _round_up(cout, 8)           # (Cout, mt) output slab rows (f32)
    per_col = 2 * 4 * (x_rows + y_rows)   # double-buffered, 4 B per f32
    while mt > 128 and per_col * mt > budget_bytes:
        mt = max(128, (mt // 2) // 128 * 128)
    return mt


def _pool_conv_stats_kernel(x_ref, wmax_ref, wmin_ref, y_ref, stats_ref):
    # x_ref:     (4*Cin, Mt)  rows = [win(0,0); win(0,1); win(1,0); win(1,1)] x Cin
    # wmax_ref:  (Cout, Cin)  1x1 conv weight acting on the max-pool half
    # wmin_ref:  (Cout, Cin)  1x1 conv weight acting on the min-pool half
    # y_ref:     (Cout, Mt)   conv output tile (lane-dense)
    # stats_ref: (Cout, 2)    per-tile partial [sum(y), sum(y*y)]
    cin = wmax_ref.shape[1]

    a = x_ref[0 * cin:1 * cin, :]
    b = x_ref[1 * cin:2 * cin, :]
    c = x_ref[2 * cin:3 * cin, :]
    d = x_ref[3 * cin:4 * cin, :]

    # 2x2 max-pool and min-pool (minpool == -maxpool(-x)) on the VPU.
    maxp = jnp.maximum(jnp.maximum(a, b), jnp.maximum(c, d))
    minp = jnp.minimum(jnp.minimum(a, b), jnp.minimum(c, d))

    # 1x1 conv on the MXU, fed directly from registers (no VMEM scratch).
    y = (jnp.dot(wmax_ref[...], maxp, preferred_element_type=jnp.float32)
         + jnp.dot(wmin_ref[...], minp, preferred_element_type=jnp.float32))
    y_ref[...] = y

    # Per-tile partial BatchNorm statistics (summed pairwise in the wrapper).
    # Zero-padded columns give y == 0 exactly, so no masking is needed.
    stats_ref[:, 0:1] = jnp.sum(y, axis=1, keepdims=True)
    stats_ref[:, 1:2] = jnp.sum(y * y, axis=1, keepdims=True)


def eve_forward(x_nchw, w_conv, gamma, beta, *, m_tile_target=4096):
    """x_nchw: (N, Cin, H, W) f32; w_conv: (Cout, 2*Cin, 1, 1); gamma/beta: (Cout,)."""
    N, Cin, H, W = x_nchw.shape
    Cout = w_conv.shape[0]
    Ho = -(-H // 2)
    Wo = -(-W // 2)

    # ceil_mode: replicate-pad spatial dims to even (exact for max & min pools).
    xp = jnp.pad(x_nchw.astype(jnp.float32),
                 ((0, 0), (0, 0), (0, 2 * Ho - H), (0, 2 * Wo - W)), mode="edge")

    # NCHW -> single lane-dense (4*Cin, M) slab, M = N*Ho*Wo (one XLA copy).
    # Row index = h_off*(2*Cin) + w_off*Cin + c.
    M = N * Ho * Wo
    xr = xp.reshape(N, Cin, Ho, 2, Wo, 2)
    xr = xr.transpose(3, 5, 1, 0, 2, 4).reshape(4 * Cin, M)

    vmem_limit = _vmem_limit_bytes()
    mt = _pick_m_tile(Cin, Cout, M, target=m_tile_target,
                      budget_bytes=(vmem_limit * 3) // 5)
    Mp = _round_up(M, mt)
    if Mp != M:
        xr = jnp.pad(xr, ((0, 0), (0, Mp - M)))  # zeros
    nm = Mp // mt

    w2 = w_conv.reshape(Cout, 2 * Cin).astype(jnp.float32)
    w_max = w2[:, :Cin]   # acts on the max-pool half of the concat
    w_min = w2[:, Cin:]   # acts on the min-pool half

    # ---- Single Pallas pass: pool + 1x1 conv + per-tile BN partial sums -----
    # All output blocks are disjoint per grid step -> "parallel" (megacore on
    # v7x).  Constant-index weight blocks are fetched once per call.
    y, stats = pl.pallas_call(
        _pool_conv_stats_kernel,
        out_shape=(jax.ShapeDtypeStruct((Cout, Mp), jnp.float32),
                   jax.ShapeDtypeStruct((nm, Cout, 2), jnp.float32)),
        grid_spec=pltpu.PrefetchScalarGridSpec(
            num_scalar_prefetch=0,
            grid=(nm,),
            in_specs=[
                pl.BlockSpec((4 * Cin, mt), lambda i: (0, i)),
                pl.BlockSpec((Cout, Cin), lambda i: (0, 0)),
                pl.BlockSpec((Cout, Cin), lambda i: (0, 0)),
            ],
            out_specs=[
                pl.BlockSpec((Cout, mt), lambda i: (0, i)),
                pl.BlockSpec((None, Cout, 2), lambda i: (i, 0, 0)),
            ],
        ),
        compiler_params=pltpu.CompilerParams(
            dimension_semantics=("parallel",),
            vmem_limit_bytes=vmem_limit,
        ),
    )(xr, w_max, w_min)

    # ---- BN finalize on tiny (Cout,) vectors (fused by XLA) -----------------
    ssum = jnp.sum(stats, axis=0)                          # (Cout, 2)
    mean = ssum[:, 0] / M
    var = jnp.maximum(ssum[:, 1] / M - mean * mean, 0.0)   # biased, like PyTorch fwd
    inv = jax.lax.rsqrt(var + BN_EPS)
    g = gamma.astype(jnp.float32)
    scale = g * inv
    shift = beta.astype(jnp.float32) - mean * scale

    # Normalize fused into the (Cout, M) -> NCHW relayout copy (saves one full
    # HBM read+write pass vs a separate normalize kernel).
    out = y[:, :M].reshape(Cout, N, Ho, Wo).transpose(1, 0, 2, 3)
    return out * scale[None, :, None, None] + shift[None, :, None, None]


def eve_reference(x_nchw, w_conv, gamma, beta):
    """Plain-JAX reference mirroring the PyTorch forward (training-mode BN)."""
    N, Cin, H, W = x_nchw.shape
    Cout = w_conv.shape[0]
    Ho, Wo = math.ceil(H / 2), math.ceil(W / 2)
    xp = jnp.pad(x_nchw, ((0, 0), (0, 0), (0, 2 * Ho - H), (0, 2 * Wo - W)),
                 mode="edge")
    xr = xp.reshape(N, Cin, Ho, 2, Wo, 2)
    mx = xr.max(axis=(3, 5))
    mn = xr.min(axis=(3, 5))
    feat = jnp.concatenate([mx, mn], axis=1)          # (N, 2Cin, Ho, Wo)
    wm = w_conv.reshape(Cout, 2 * Cin)
    y = jnp.einsum("nchw,oc->nohw", feat, wm)
    mean = y.mean(axis=(0, 2, 3), keepdims=True)
    var = y.var(axis=(0, 2, 3), keepdims=True)        # biased, like PyTorch fwd
    y = (y - mean) / jnp.sqrt(var + BN_EPS)
    return y * gamma[None, :, None, None] + beta[None, :, None, None]


if __name__ == "__main__":
    key = jax.random.PRNGKey(0)

    def run_case(case_key, N, Cin, H, W, Cout):
        k_x, k_w, k_g, k_b = jax.random.split(case_key, 4)
        x = jax.random.normal(k_x, (N, Cin, H, W), dtype=jnp.float32)
        # Conv2d(2*cin, cout, 1, bias=False) weight: (Cout, 2*Cin, 1, 1)
        w_conv = 0.2 * jax.random.normal(k_w, (Cout, 2 * Cin, 1, 1),
                                         dtype=jnp.float32)
        gamma = 1.0 + 0.1 * jax.random.normal(k_g, (Cout,), dtype=jnp.float32)
        beta = 0.1 * jax.random.normal(k_b, (Cout,), dtype=jnp.float32)

        out = jax.block_until_ready(jax.jit(eve_forward)(x, w_conv, gamma, beta))
        ref = jax.block_until_ready(eve_reference(x, w_conv, gamma, beta))

        Ho, Wo = math.ceil(H / 2), math.ceil(W / 2)
        assert out.shape == (N, Cout, Ho, Wo), out.shape
        err = float(jnp.max(jnp.abs(out - ref)))
        assert err < 2e-4, err

    k1, k2 = jax.random.split(key)
    run_case(k1, 2, 4, 16, 16, 8)   # main shape from the spec
    run_case(k2, 1, 3, 7, 9, 8)     # odd spatial -> exercises ceil_mode + M padding
    print("KERNEL_OK")
</pallas_src>

<mosaic_0001>
module attributes {stable_mosaic.version = 11 : i64} {
  func.func @_pool_conv_stats_kernel(%arg0: i32, %arg1: memref<16x128xf32, #tpu.memory_space<vmem>>, %arg2: memref<8x4xf32, #tpu.memory_space<vmem>>, %arg3: memref<8x4xf32, #tpu.memory_space<vmem>>, %arg4: memref<8x128xf32, #tpu.memory_space<vmem>>, %arg5: memref<1x8x2xf32, #tpu.memory_space<vmem>>) attributes {dimension_semantics = [#tpu.dimension_semantics<parallel>], iteration_bounds = array<i64: 1>, scalar_prefetch = 0 : i64, scratch_operands = 0 : i64, tpu.core_type = #tpu.core_type<tc>, window_params = [{transform_indices = @transform_0, window_bounds = array<i64: 16, 128>}, {pipeline_mode = #tpu.pipeline_mode<synchronous>, transform_indices = @transform_1, window_bounds = array<i64: 8, 4>}, {pipeline_mode = #tpu.pipeline_mode<synchronous>, transform_indices = @transform_2, window_bounds = array<i64: 8, 4>}, {transform_indices = @transform_3, window_bounds = array<i64: 8, 128>}, {transform_indices = @transform_4, window_bounds = array<i64: 1, 8, 2>}]} {
    %c0 = arith.constant 0 : index
    %c0_0 = arith.constant 0 : index
    %0 = vector.load %arg1[%c0, %c0_0] : memref<16x128xf32, #tpu.memory_space<vmem>>, vector<4x128xf32>
    %c4 = arith.constant 4 : index
    %c0_1 = arith.constant 0 : index
    %1 = vector.load %arg1[%c4, %c0_1] : memref<16x128xf32, #tpu.memory_space<vmem>>, vector<4x128xf32>
    %c8 = arith.constant 8 : index
    %c0_2 = arith.constant 0 : index
    %2 = vector.load %arg1[%c8, %c0_2] : memref<16x128xf32, #tpu.memory_space<vmem>>, vector<4x128xf32>
    %c12 = arith.constant 12 : index
    %c0_3 = arith.constant 0 : index
    %3 = vector.load %arg1[%c12, %c0_3] : memref<16x128xf32, #tpu.memory_space<vmem>>, vector<4x128xf32>
    %4 = arith.maximumf %0, %1 : vector<4x128xf32>
    %5 = arith.maximumf %2, %3 : vector<4x128xf32>
    %6 = arith.maximumf %4, %5 : vector<4x128xf32>
    %7 = arith.minimumf %0, %1 : vector<4x128xf32>
    %8 = arith.minimumf %2, %3 : vector<4x128xf32>
    %9 = arith.minimumf %7, %8 : vector<4x128xf32>
    %c0_4 = arith.constant 0 : index
    %c0_5 = arith.constant 0 : index
    %10 = vector.load %arg2[%c0_4, %c0_5] : memref<8x4xf32, #tpu.memory_space<vmem>>, vector<8x4xf32>
    %cst = arith.constant dense<0.000000e+00> : vector<8x128xf32>
    %11 = tpu.matmul %10, %6, %cst {dimension_numbers = #tpu.dot_dimension_numbers<[1], [0], [0], [1], [0, 0, 1, 1], [], []>} : vector<8x4xf32>, vector<4x128xf32>, vector<8x128xf32> -> vector<8x128xf32>
    %c0_6 = arith.constant 0 : index
    %c0_7 = arith.constant 0 : index
    %12 = vector.load %arg3[%c0_6, %c0_7] : memref<8x4xf32, #tpu.memory_space<vmem>>, vector<8x4xf32>
    %cst_8 = arith.constant dense<0.000000e+00> : vector<8x128xf32>
    %13 = tpu.matmul %12, %9, %cst_8 {dimension_numbers = #tpu.dot_dimension_numbers<[1], [0], [0], [1], [0, 0, 1, 1], [], []>} : vector<8x4xf32>, vector<4x128xf32>, vector<8x128xf32> -> vector<8x128xf32>
    %14 = arith.addf %11, %13 : vector<8x128xf32>
    %c0_9 = arith.constant 0 : index
    %c0_10 = arith.constant 0 : index
    %15 = vector.load %arg4[%c0_9, %c0_10] : memref<8x128xf32, #tpu.memory_space<vmem>>, vector<8x128xf32>
    tpu.vector_store %arg4[%c0_9, %c0_10], %14 {strides = array<i32>} : memref<8x128xf32, #tpu.memory_space<vmem>>, vector<8x128xf32>,
    %cst_11 = arith.constant dense<0.000000e+00> : vector<8xf32>
    %16 = vector.multi_reduction <add>, %14, %cst_11 [1] : vector<8x128xf32> to vector<8xf32>
    %17 = vector.shape_cast %16 : vector<8xf32> to vector<8x1xf32>
    %c0_12 = arith.constant 0 : index
    %c0_13 = arith.constant 0 : index
    %c0_14 = arith.constant 0 : index
    %18 = vector.load %arg5[%c0_12, %c0_13, %c0_14] : memref<1x8x2xf32, #tpu.memory_space<vmem>>, vector<1x8x1xf32>
    %19 = vector.shape_cast %18 : vector<1x8x1xf32> to vector<8x1xf32>
    %20 = vector.shape_cast %17 : vector<8x1xf32> to vector<1x8x1xf32>
    tpu.vector_store %arg5[%c0_12, %c0_13, %c0_14], %20 {strides = array<i32>} : memref<1x8x2xf32, #tpu.memory_space<vmem>>, vector<1x8x1xf32>,
    %21 = arith.mulf %14, %14 : vector<8x128xf32>
    %cst_15 = arith.constant dense<0.000000e+00> : vector<8xf32>
    %22 = vector.multi_reduction <add>, %21, %cst_15 [1] : vector<8x128xf32> to vector<8xf32>
    %23 = vector.shape_cast %22 : vector<8xf32> to vector<8x1xf32>
    %c0_16 = arith.constant 0 : index
    %c0_17 = arith.constant 0 : index
    %c1 = arith.constant 1 : index
    %24 = vector.load %arg5[%c0_16, %c0_17, %c1] : memref<1x8x2xf32, #tpu.memory_space<vmem>>, vector<1x8x1xf32>
    %25 = vector.shape_cast %24 : vector<1x8x1xf32> to vector<8x1xf32>
    %26 = vector.shape_cast %23 : vector<8x1xf32> to vector<1x8x1xf32>
    tpu.vector_store %arg5[%c0_16, %c0_17, %c1], %26 {strides = array<i32>} : memref<1x8x2xf32, #tpu.memory_space<vmem>>, vector<1x8x1xf32>,
    return
  }
  func.func @transform_0(%arg0: i32) -> (i32, i32) {
    %c0_i32 = arith.constant 0 : i32
    %c0_i32_0 = arith.constant 0 : i32
    return %c0_i32, %arg0 : i32, i32
  }
  func.func @transform_1(%arg0: i32) -> (i32, i32) {
    %c0_i32 = arith.constant 0 : i32
    %c0_i32_0 = arith.constant 0 : i32
    %c0_i32_1 = arith.constant 0 : i32
    return %c0_i32, %c0_i32_0 : i32, i32
  }
  func.func @transform_2(%arg0: i32) -> (i32, i32) {
    %c0_i32 = arith.constant 0 : i32
    %c0_i32_0 = arith.constant 0 : i32
    %c0_i32_1 = arith.constant 0 : i32
    return %c0_i32, %c0_i32_0 : i32, i32
  }
  func.func @transform_3(%arg0: i32) -> (i32, i32) {
    %c0_i32 = arith.constant 0 : i32
    %c0_i32_0 = arith.constant 0 : i32
    return %c0_i32, %arg0 : i32, i32
  }
  func.func @transform_4(%arg0: i32) -> (i32, i32, i32) {
    %c0_i32 = arith.constant 0 : i32
    %c0_i32_0 = arith.constant 0 : i32
    %c0_i32_1 = arith.constant 0 : i32
    return %arg0, %c0_i32, %c0_i32_0 : i32, i32, i32
  }
}

</mosaic_0001>

<bundles_post_ra>
// kernel: eve_forward.1
= control target key start
LH: loop header
LB: loop body
LE: loop exit
PB: predicated region body
PF: predicated region fallthrough
CT: control target
= control target key end

     0   :  { %10 = vsyncpa [#allocation3], 0  ;;  %s508_s0 = inlined_call_operand.hbm [shape: f32[16,128], index: 0, kind: input, shape index: {}]   ;;  %s509_s1 = inlined_call_operand.hbm [shape: f32[8,4], index: 1, kind: input, shape index: {}]   ;;  %s510_s2 = inlined_call_operand.hbm [shape: f32[8,4], index: 2, kind: input, shape index: {}]   ;;  %s511_s3 = inlined_call_operand.hbm [shape: f32[8,128], index: 3, kind: output, shape index: {0}]   ;;  %s512_s4 = inlined_call_operand.hbm [shape: f32[1,8,2], index: 4, kind: output, shape index: {1}]  }
   0x1   :  { %11 = vsyncpa [#allocation6], 0 }
   0x2   :  { %12 = vsyncpa [#allocation4], 0 }
   0x3   :  { %13 = vsyncpa [#allocation10], 0  ;;  %s407_s15 = smov [#allocation5]   ;;  %s408_s17 = smov [#allocation2]  }
   0x4   :  { %s32_s16 = sshll.u32 %s407_s15, 4  ;;  %s19_s18 = sshll.u32 %s408_s17, 4  ;;  %s33_s16 = int_to_ptr.vmem [resolvable:$true] %s32_s16  ;;  %s441_s18 = int_to_ptr.vmem [resolvable:$true] %s19_s18 }
   0x5   :  { %s289_s21 = scalar_lea.hbm %s509_s1, 128 }
   0x6   :  { %p290_p0 = scmp.ne.s32.totalorder %s509_s1, %s289_s21  ;;  %p293_p1 = scmp.lt.u32.totalorder %s289_s21, %s509_s1 }
   0x8   :  { %p295_p2 = pnand %p293_p1, %p290_p0 }
   0xa   :  { %298 = shalt.err (!%p295_p2)
}
   0xb   :  { %s299_s26 = scalar_lea.vmem %s33_s16, 128  ;;  %p304_p4 = scmp.lt.s32.totalorder %s33_s16, %s33_s16 }
   0xc   :  { %p300_p3 = scmp.ne.s32.totalorder %s33_s16, %s299_s26  ;;  %p305_p5 = scmp.lt.s32.totalorder %s299_s26, %s299_s26 }
   0xe   :  { %p306_p6 = por %p305_p5, %p304_p4 }
  0x10   :  { %p307_p7 = pnand %p306_p6, %p300_p3 }
  0x12   :  { %310 = shalt.err (!%p307_p7)
}
  0x13   :  { %35 = dma.hbm_to_vmem [thread:$0]  %s509_s1, 128, %s33_s16, [#allocation6]  }
  0x14   :  { %s311_s5 = scalar_lea.hbm %s508_s0, 256 }
  0x15   :  { %p312_p8 = scmp.ne.s32.totalorder %s508_s0, %s311_s5  ;;  %p315_p9 = scmp.lt.u32.totalorder %s311_s5, %s508_s0 }
  0x17   :  { %p317_p10 = pnand %p315_p9, %p312_p8 }
  0x19   :  { %320 = shalt.err (!%p317_p10)
}
  0x1a   :  { %s321_s10 = scalar_lea.vmem %s441_s18, 256  ;;  %p326_p12 = scmp.lt.s32.totalorder %s441_s18, %s441_s18 }
  0x1b   :  { %p322_p11 = scmp.ne.s32.totalorder %s441_s18, %s321_s10  ;;  %p327_p13 = scmp.lt.s32.totalorder %s321_s10, %s321_s10 }
  0x1d   :  { %p328_p0 = por %p327_p13, %p326_p12 }
  0x1f   :  { %p329_p1 = pnand %p328_p0, %p322_p11 }
  0x21   :  { %332 = shalt.err (!%p329_p1)
}
  0x22   :  { %s409_s1 = smov 128   ;;  %s410_s11 = smov 8  }
  0x23   :  { %25 = dma.hbm_to_vmem [thread:$0]  %s508_s0, 256, %s441_s18, [#allocation3], %s409_s1, %s409_s1, %s410_s11  }
  0x24   :  { %s411_s14 = smov [#allocation7]   ;;  %s333_s19 = scalar_lea.hbm %s510_s2, 128 }
  0x25   :  { %s42_s15 = sshll.u32 %s411_s14, 4  ;;  %p334_p2 = scmp.ne.s32.totalorder %s510_s2, %s333_s19  ;;  %s43_s15 = int_to_ptr.vmem [resolvable:$true] %s42_s15 }
  0x26   :  { %p337_p3 = scmp.lt.u32.totalorder %s333_s19, %s510_s2 }
  0x28   :  { %p339_p4 = pnand %p337_p3, %p334_p2 }
  0x2a   :  { %342 = shalt.err (!%p339_p4)
}
  0x2b   :  { %s343_s24 = scalar_lea.vmem %s43_s15, 128  ;;  %p348_p6 = scmp.lt.s32.totalorder %s43_s15, %s43_s15 }
  0x2c   :  { %p344_p5 = scmp.ne.s32.totalorder %s43_s15, %s343_s24  ;;  %p349_p7 = scmp.lt.s32.totalorder %s343_s24, %s343_s24 }
  0x2e   :  { %p350_p8 = por %p349_p7, %p348_p6 }
  0x30   :  { %p351_p9 = pnand %p350_p8, %p344_p5 }
  0x32   :  { %354 = shalt.err (!%p351_p9)
}
  0x33   :  { %45 = dma.hbm_to_vmem [thread:$0]  %s510_s2, 128, %s43_s15, [#allocation6]  }
  0x34   :  { %399 = dma.done.wait [#allocation3], 256  }
  0x35   :  { %400 = vsyncadd [#allocation3], 4294967040 }
  0x36   :  { %401 = dma.done.wait [#allocation6], 256  }
  0x37   :  { %402 = vsyncadd [#allocation6], 4294967040  ;;  %v412_v0 = vmov 0.0   ;;  %vm413_vm0 = vmmov 0   ;;  %v55_v1 = vld [vmem:[#allocation2] sm:$0xf] }
  0x38   :  { %269 = vmatprep.subr.mxu1 %v412_v0  ;;  %274 = vmatprep.subr.mxu0 %v412_v0  ;;  %v56_v2 = vld [vmem:[#allocation2 + $0x4] sm:$0xf]  ;;  %v57_v3 = vld [vmem:[#allocation2 + $0x8] sm:$0xf]  ;;  %v58_v4 = vld [vmem:[#allocation2 + $0xc] sm:$0xf] }
  0x39   :  { %271 = vmatprep.mubr.msk.f32.mxu1 %vm413_vm0, %v412_v0  ;;  %276 = vmatprep.mubr.msk.f32.mxu0 %vm413_vm0, %v412_v0  ;;  %v62_v5 = vmin.f32 %v55_v1, %v56_v2  ;;  %v59_v6 = vmax.f32 %v55_v1, %v56_v2  ;;  %v63_v7 = vmin.f32 %v57_v3, %v58_v4  ;;  %vm71_vm1 = vcmask 1043456   ;;  %v66_v11 = vld [vmem:[#allocation7] sm:$0xff]  ;;  %v65_v12 = vld [vmem:[#allocation5] sm:$0xff]  ;;  %s414_s2 = smov [#allocation8]  }
  0x3a   :  { %v60_v8 = vmax.f32 %v57_v3, %v58_v4  ;;  %vm67_vm2 = vcmask 31744   ;;  %s237_s25 = sshll.u32 %s414_s2, 4  ;;  %s238_s25 = int_to_ptr.vmem [resolvable:$true] %s237_s25 }
  0x3b   :  { %v64_v9 = vmin.f32 %v62_v5, %v63_v7  ;;  %s355_s26 = scalar_lea.vmem %s238_s25, 128  ;;  %p360_p11 = scmp.lt.s32.totalorder %s238_s25, %s238_s25 }
  0x3c   :  { %v61_v10 = vmax.f32 %v59_v6, %v60_v8  ;;  %p356_p10 = scmp.ne.s32.totalorder %s238_s25, %s355_s26  ;;  %p361_p12 = scmp.lt.s32.totalorder %s355_s26, %s355_s26 }
  0x3d   :  { %270 = vmatpush3.msk.msra.mxu1 %vm71_vm1, %v64_v9 }
  0x3e   :  { %275 = vmatpush3.msk.msra.mxu0 %vm71_vm1, %v61_v10  ;;  %272 = vmatmul.mubr.msk.f32.vlgmr.msra.gmra.mrb[0].mxu1 %vm67_vm2, %v66_v11  ;;  %p362_p13 = por %p361_p12, %p360_p11 }
  0x3f   :  { %277 = vmatmul.mubr.msk.f32.vlgmr.msra.gmra.mrb[0].mxu0 %vm67_vm2, %v65_v12 }
  0x40   :  { %p363_p0 = pnand %p362_p13, %p356_p10 }
 0x111   :  { %v141_v13 = vpop.f32.mrb[0].mxu1 }
 0x112   :  { %v217_v14 = vpop.f32.mrb[0].mxu0  ;;  %v273_v16 = vpop.f32.mrb[1].mxu1 }
 0x113   :  { %v218_v15 = vadd.f32 %v217_v14, %v141_v13  ;;  %v278_v17 = vpop.f32.mrb[1].mxu0 }
 0x115   :  { %221 = vst [vmem:[#allocation8] sm:$0xff] %v218_v15  ;;  %222 = vadd.xlane.f32.xlu0 %v218_v15  ;;  %v226_v18 = vmul.f32 %v218_v15, %v218_v15 }
 0x119   :  { %227 = vadd.xlane.f32.xlu0 %v226_v18 }
 0x11a   :  { %366 = shalt.err (!%p363_p0)
}
 0x11b   :  { %s367_s29 = scalar_lea.hbm %s511_s3, 128 }
 0x11c   :  { %p368_p1 = scmp.ne.s32.totalorder %s511_s3, %s367_s29  ;;  %p371_p2 = scmp.lt.u32.totalorder %s367_s29, %s511_s3 }
 0x11e   :  { %p373_p3 = pnand %p371_p2, %p368_p1 }
 0x120   :  { %376 = shalt.err (!%p373_p3)
}
 0x121   :  { %240 = dma.vmem_to_hbm [thread:$0]  %s238_s25, 128, %s511_s3, [#allocation4]   ;;  %vm224_vm3 = vcmask 7168   ;;  %vm229_vm4 = vcmask 15368  }
 0x122   :  { %s415_s10 = smov [#allocation9]  }
 0x123   :  { %s247_s1 = sshll.u32 %s415_s10, 4  ;;  %s248_s1 = int_to_ptr.vmem [resolvable:$true] %s247_s1 }
 0x124   :  { %s377_s11 = scalar_lea.vmem %s248_s1, 128  ;;  %p382_p5 = scmp.lt.s32.totalorder %s248_s1, %s248_s1 }
 0x125   :  { %p378_p4 = scmp.ne.s32.totalorder %s248_s1, %s377_s11  ;;  %p383_p6 = scmp.lt.s32.totalorder %s377_s11, %s377_s11 }
 0x127   :  { %p384_p7 = por %p383_p6, %p382_p5 }
 0x129   :  { %p385_p8 = pnand %p384_p7, %p378_p4 }
 0x1a2   :  { %v223_v19 = vpop.xlane.xlu0 %222 }
 0x1a3   :  { %225 = vst.msk [vmem:[#allocation9] sm:$0xff] %vm224_vm3, %v223_v19 }
 0x1a6   :  { %v228_v20 = vpop.xlane.xlu0 %227 }
 0x1a7   :  { %230 = vst.msk [vmem:[#allocation9] sm:$0xff] %vm229_vm4, %v228_v20 }
 0x1a8   :  { %388 = shalt.err (!%p385_p8)
}
 0x1a9   :  { %s389_s3 = scalar_lea.hbm %s512_s4, 128 }
 0x1aa   :  { %p390_p9 = scmp.ne.s32.totalorder %s512_s4, %s389_s3  ;;  %p393_p10 = scmp.lt.u32.totalorder %s389_s3, %s512_s4 }
 0x1ac   :  { %p395_p11 = pnand %p393_p10, %p390_p9 }
 0x1ae   :  { %398 = shalt.err (!%p395_p11)
}
 0x1af   :  { %250 = dma.vmem_to_hbm [thread:$0]  %s248_s1, 128, %s512_s4, [#allocation10]  }
 0x1b0   :  { %403 = dma.done.wait [#allocation4], 128  }
 0x1b1   :  { %404 = vsyncadd [#allocation4], 4294967168 }
 0x1b2   :  { %405 = dma.done.wait [#allocation10], 128  }
 0x1b3   :  { %406 = vsyncadd [#allocation10], 4294967168 }
 0x1b4   :  { %257 = vsyncpa [#allocation3], 1 }
 0x1b5   :  { %258 = vsyncpa [#allocation6], 1 }
 0x1b6   :  { %259 = vsyncpa [#allocation4], 1 }
 0x1b7   :  { %260 = vsyncpa [#allocation10], 1 }

</bundles_post_ra>
